<compile_context>
chip_gen: v6e
topology: v6e:2x2x1
jax: 0.10.0
libtpu: 0.0.40
codegen_flags: <defaults>
</compile_context>

<pallas_src>
import jax
import jax.numpy as jnp
from jax.experimental import pallas as pl
from jax.experimental.pallas import tpu as pltpu


def _norm_kernel(scale_ref, bias_ref, img_ref, out_ref):
    # scale_ref / bias_ref: (Rb, 1) f32, broadcast along the lane dim.
    # img_ref / out_ref  : (Rb, Cb) tiles.
    x = img_ref[...]
    out_ref[...] = (x * scale_ref[...] + bias_ref[...]).astype(out_ref.dtype)


def _choose_blocks(rows, cols, itemsize):
    """Pick a lane-dense (Rb, Cb) block with ~4 MiB of input per grid step."""
    LANE, SUB = 128, 8
    MAX_LANES = 8192          # cap lane-dim block (multiple of 128)
    TARGET = 4 << 20          # ~4 MiB input bytes per step

    if cols % LANE == 0:
        cb = min(cols, MAX_LANES)
    elif cols > MAX_LANES:
        cb = MAX_LANES        # multiple of 128; partial last block is masked
    else:
        cb = cols             # full lane dim (always legal)

    rows_fit = max(SUB, (TARGET // (cb * itemsize)) // SUB * SUB)
    rb = rows if rows <= rows_fit else rows_fit   # full dim or multiple of 8
    return rb, cb


def normalization_forward(img: jax.Array, mean: jax.Array, std: jax.Array) -> jax.Array:
    """(img - mean[c]) / std[c], broadcasting mean/std over (N, H, W)."""
    N, C, H, W = img.shape
    assert mean.shape == (C,) and std.shape == (C,)
    R, HW = N * C, H * W

    # Precompute per-row affine params (C-sized work, once, in plain JAX).
    # NOTE: if std can contain exact zeros, inf/nan propagation differs
    # slightly from the literal (x - m) / s form (mul-add vs divide).
    scale_c = 1.0 / std.astype(jnp.float32)
    bias_c = -mean.astype(jnp.float32) * scale_c
    scale = jnp.broadcast_to(scale_c[None, :], (N, C)).reshape(R, 1)
    bias = jnp.broadcast_to(bias_c[None, :], (N, C)).reshape(R, 1)

    img2d = img.reshape(R, HW)
    Rb, Cb = _choose_blocks(R, HW, img.dtype.itemsize)
    grid = (pl.cdiv(R, Rb), pl.cdiv(HW, Cb))

    out2d = pl.pallas_call(
        _norm_kernel,
        out_shape=jax.ShapeDtypeStruct((R, HW), img.dtype),
        grid=grid,
        in_specs=[
            pl.BlockSpec((Rb, 1), lambda i, j: (i, 0)),    # scale
            pl.BlockSpec((Rb, 1), lambda i, j: (i, 0)),    # bias
            pl.BlockSpec((Rb, Cb), lambda i, j: (i, j)),   # img
        ],
        out_specs=pl.BlockSpec((Rb, Cb), lambda i, j: (i, j)),
        compiler_params=pltpu.CompilerParams(
            dimension_semantics=("parallel", "parallel"),
        ),
    )(scale, bias, img2d)

    return out2d.reshape(N, C, H, W)


if __name__ == "__main__":
    # Deterministic small test shapes consistent with the module's forward.
    N, C, H, W = 2, 4, 16, 16

    key = jax.random.PRNGKey(0)
    k_img, k_mean, k_std = jax.random.split(key, 3)

    img = jax.random.uniform(k_img, (N, C, H, W), dtype=jnp.float32)
    mean = jax.random.uniform(k_mean, (C,), dtype=jnp.float32, minval=0.3, maxval=0.6)
    std = jax.random.uniform(k_std, (C,), dtype=jnp.float32, minval=0.2, maxval=0.4)

    out = normalization_forward(img, mean, std)
    out = jax.block_until_ready(out)

    # Reference: (img - mean.view(-1,1,1)) / std.view(-1,1,1)
    ref = (img - mean[None, :, None, None]) / std[None, :, None, None]
    assert out.shape == (N, C, H, W)
    assert jnp.allclose(out, ref, atol=1e-5, rtol=1e-5)

    print("KERNEL_OK")
</pallas_src>

<mosaic_0001>
module attributes {stable_mosaic.version = 11 : i64} {
  func.func @_norm_kernel(%arg0: i32, %arg1: i32, %arg2: memref<8x1xf32, #tpu.memory_space<vmem>>, %arg3: memref<8x1xf32, #tpu.memory_space<vmem>>, %arg4: memref<8x256xf32, #tpu.memory_space<vmem>>, %arg5: memref<8x256xf32, #tpu.memory_space<vmem>>) attributes {dimension_semantics = [#tpu.dimension_semantics<parallel>, #tpu.dimension_semantics<parallel>], iteration_bounds = array<i64: 1, 1>, scalar_prefetch = 0 : i64, scratch_operands = 0 : i64, tpu.core_type = #tpu.core_type<tc>, window_params = [{transform_indices = @transform_0, window_bounds = array<i64: 8, 1>}, {transform_indices = @transform_1, window_bounds = array<i64: 8, 1>}, {transform_indices = @transform_2, window_bounds = array<i64: 8, 256>}, {transform_indices = @transform_3, window_bounds = array<i64: 8, 256>}]} {
    %c0 = arith.constant 0 : index
    %c0_0 = arith.constant 0 : index
    %0 = vector.load %arg4[%c0, %c0_0] : memref<8x256xf32, #tpu.memory_space<vmem>>, vector<8x256xf32>
    %c0_1 = arith.constant 0 : index
    %c0_2 = arith.constant 0 : index
    %1 = vector.load %arg2[%c0_1, %c0_2] : memref<8x1xf32, #tpu.memory_space<vmem>>, vector<8x1xf32>
    %2 = vector.broadcast %1 : vector<8x1xf32> to vector<8x256xf32>
    %3 = arith.mulf %0, %2 : vector<8x256xf32>
    %c0_3 = arith.constant 0 : index
    %c0_4 = arith.constant 0 : index
    %4 = vector.load %arg3[%c0_3, %c0_4] : memref<8x1xf32, #tpu.memory_space<vmem>>, vector<8x1xf32>
    %5 = vector.broadcast %4 : vector<8x1xf32> to vector<8x256xf32>
    %6 = arith.addf %3, %5 : vector<8x256xf32>
    %c0_5 = arith.constant 0 : index
    %c0_6 = arith.constant 0 : index
    %7 = vector.load %arg5[%c0_5, %c0_6] : memref<8x256xf32, #tpu.memory_space<vmem>>, vector<8x256xf32>
    tpu.vector_store %arg5[%c0_5, %c0_6], %6 {strides = array<i32>} : memref<8x256xf32, #tpu.memory_space<vmem>>, vector<8x256xf32>,
    return
  }
  func.func @transform_0(%arg0: i32, %arg1: i32) -> (i32, i32) {
    %c0_i32 = arith.constant 0 : i32
    %c0_i32_0 = arith.constant 0 : i32
    return %arg0, %c0_i32 : i32, i32
  }
  func.func @transform_1(%arg0: i32, %arg1: i32) -> (i32, i32) {
    %c0_i32 = arith.constant 0 : i32
    %c0_i32_0 = arith.constant 0 : i32
    return %arg0, %c0_i32 : i32, i32
  }
  func.func @transform_2(%arg0: i32, %arg1: i32) -> (i32, i32) {
    %c0_i32 = arith.constant 0 : i32
    return %arg0, %arg1 : i32, i32
  }
  func.func @transform_3(%arg0: i32, %arg1: i32) -> (i32, i32) {
    %c0_i32 = arith.constant 0 : i32
    return %arg0, %arg1 : i32, i32
  }
}

</mosaic_0001>

<bundles_post_ra>
// kernel: tpu_custom_call.1
= control target key start
LH: loop header
LB: loop body
LE: loop exit
PB: predicated region body
PF: predicated region fallthrough
CT: control target
= control target key end

     0   :  { %v74_v1 = vmov 0   ;;  %s111_s0 = inlined_call_operand.vmem [shape: f32[8,1], index: 0, kind: input, shape index: {}]   ;;  %s112_s1 = inlined_call_operand.vmem [shape: f32[8,1], index: 1, kind: input, shape index: {}]   ;;  %s113_s2 = inlined_call_operand.vmem [shape: f32[8,256], index: 2, kind: input, shape index: {}]   ;;  %s114_s3 = inlined_call_operand.hbm [shape: f32[8,256], index: 3, kind: output, shape index: {}]  }
   0x1   :  { %v17_v0 = vld [vmem:[%s111_s0] sm:$0xff]  ;;  %51 = vset.pattern.permute.xlu0 %v74_v1 }
   0x2   :  { %8 = vsyncpa [#allocation3], 0  ;;  %20 = vperm.xlu0 %51, %v17_v0   ;;  %v25_v2 = vld [vmem:[%s112_s1] sm:$0xff]  ;;  %v16_v5 = vld [vmem:[%s113_s2 + $0x8] sm:$0xff]  ;;  %s75_s20 = smov [#allocation2]  }
   0x3   :  { %v15_v4 = vld [vmem:[%s113_s2] sm:$0xff]  ;;  %s41_s0 = sshll.u32 %s75_s20, 4  ;;  %s42_s0 = int_to_ptr.vmem [resolvable:$true] %s41_s0 }
   0x4   :  { %s52_s1 = scalar_lea.vmem %s42_s0, 256  ;;  %p57_p1 = scmp.lt.s32.totalorder %s42_s0, %s42_s0 }
   0x5   :  { %p53_p0 = scmp.ne.s32.totalorder %s42_s0, %s52_s1  ;;  %p58_p2 = scmp.lt.s32.totalorder %s52_s1, %s52_s1 }
   0x6   :  { %28 = vperm.xlu0 %51, %v25_v2  }
   0x7   :  { %p59_p3 = por %p58_p2, %p57_p1 }
   0x9   :  { %p60_p4 = pnand %p59_p3, %p53_p0 }
  0x7d   :  { %v21_v3 = vpop.permute.xlu0 %20 }
  0x7e   :  { %v23_v6 = vmul.f32 %v21_v3, %v15_v4  ;;  %v24_v7 = vmul.f32 %v21_v3, %v16_v5 }
  0x81   :  { %v29_v8 = vpop.permute.xlu0 %28 }
  0x82   :  { %v31_v9 = vadd.f32 %v29_v8, %v23_v6  ;;  %v32_v10 = vadd.f32 %v29_v8, %v24_v7 }
  0x84   :  { %33 = vst [vmem:[#allocation2] sm:$0xff] %v31_v9  ;;  %34 = vst [vmem:[#allocation2 + $0x8] sm:$0xff] %v32_v10 }
  0x85   :  { %63 = shalt.err (!%p60_p4)
}
  0x86   :  { %44 = dma.vmem_to_hbm [thread:$0]  %s42_s0, 256, %s114_s3, [#allocation3]  }
  0x87   :  { %72 = dma.done.wait [#allocation3], 256  }
  0x88   :  { %73 = vsyncadd [#allocation3], 4294967040 }
  0x89   :  { %48 = vsyncpa [#allocation3], 1 }

</bundles_post_ra>
